<compile_context>
chip_gen: v5e
topology: v5e:2x2
jax: 0.10.0
libtpu: 0.0.40
codegen_flags: <defaults>
</compile_context>

<pallas_src>
import math

import jax
import jax.numpy as jnp
from jax import lax
from jax.experimental import pallas as pl
from jax.experimental.pallas import tpu as pltpu


# ---------------------------------------------------------------------------
# Kernels
# ---------------------------------------------------------------------------
def _block_kernel(x_ref, w_ref, b_ref, g_ref, o_ref):
    """One (batch, node-tile): 1x1 conv + RMSNorm + SiLU on a (C, TN) slab."""
    x = x_ref[...]                                   # (C_in, TN), batch squeezed
    w = w_ref[...]                                   # (C_out, C_in), resident
    y = jnp.dot(w, x, preferred_element_type=jnp.float32) + b_ref[...]

    # RMSNorm == F.normalize(y, dim=channels) * (g * sqrt(C_out)); g prescaled
    # in the wrapper.  rsqrt of the clamped sum-of-squares == 1/max(||y||,1e-12)
    # and runs on the EUP.
    sumsq = jnp.sum(y * y, axis=0, keepdims=True)    # (1, TN)
    inv = lax.rsqrt(jnp.maximum(sumsq, 1e-24))

    # Post-norm epilogue in g's dtype (bf16 when I/O is bf16 -> bf16 VALU on
    # v6e/v7x); stays f32 otherwise.
    y = (y * inv).astype(g_ref.dtype) * g_ref[...]
    y = y * jax.nn.sigmoid(y)                        # SiLU; dropout(p=0) identity
    o_ref[...] = y.astype(o_ref.dtype)


def _block_kernel_ss(x_ref, w_ref, b_ref, m_ref, sh_ref, o_ref):
    """Same, plus affine `y*(scale+1)+shift`; m = g*sqrt(C)*(scale+1) folded
    in the wrapper so only one multiplier stream reaches the kernel."""
    x = x_ref[...]
    w = w_ref[...]
    y = jnp.dot(w, x, preferred_element_type=jnp.float32) + b_ref[...]

    sumsq = jnp.sum(y * y, axis=0, keepdims=True)
    inv = lax.rsqrt(jnp.maximum(sumsq, 1e-24))

    y = (y * inv).astype(m_ref.dtype) * m_ref[...] + sh_ref[...]
    y = y * jax.nn.sigmoid(y)
    o_ref[...] = y.astype(o_ref.dtype)


# ---------------------------------------------------------------------------
# Wrapper helpers
# ---------------------------------------------------------------------------
def _vmem_capacity_bytes():
    try:
        return int(pltpu.get_tpu_info().vmem_capacity_bytes)
    except Exception:
        return 128 * 1024 * 1024      # v5e/v6e default if the query is unavailable


def _choose_tile_n(n, batch, c_in, c_out, esize, vmem_cap):
    """Node-tile size: lane-dense (128-multiple), sized so double-buffered I/O
    tiles *plus f32 intermediates* fit a generation-aware VMEM budget, and so
    the parallel grid has >= 2 steps (megacore balance on v7x)."""
    # Per-node-column VMEM cost: 2x-buffered x/out tiles + ~4 f32 temporaries.
    per_node = 2 * (c_in + c_out) * esize + 4 * 4 * c_out
    budget = int(vmem_cap * 0.35)     # headroom for params / compiler scratch
    tn = budget // max(per_node, 1)
    tn = max(256, min(tn, 8192))
    tn = max(128, (tn // 128) * 128)
    if n <= tn:
        tn = n                        # single full-dim block: no (8,128) constraint
    # Megacore balance: ensure at least 2 parallel grid steps when possible.
    if batch * pl.cdiv(n, tn) < 2 and n >= 256:
        tn = 128 * pl.cdiv(pl.cdiv(n, 2), 128)
    return tn


# ---------------------------------------------------------------------------
# Wrapper
# ---------------------------------------------------------------------------
def block_forward(x, w, b, g, scale_shift=None, *, tile_n=None,
                  io_dtype=None, vmem_limit_bytes=None):
    """
    x: [B, C_in, N]    (NCW, as PyTorch Conv1d input)
    w: [C_out, C_in]   (Conv1d weight, size-1 kernel axis squeezed)
    b: [C_out, 1]      (Conv1d bias)
    g: [C_out, 1]      (RMSNorm gain)
    scale_shift: optional (scale, shift), each [B, C_out, 1]
    io_dtype: optional dtype for kernel I/O / MXU operands (e.g. bf16 to halve
              HBM traffic on v5e/v6e); defaults to x.dtype.  Norm math and the
              matmul accumulation stay f32 regardless.
    returns: [B, C_out, N] in io_dtype (or x.dtype)
    """
    B, C_in, N = x.shape
    C_out = w.shape[0]
    out_dtype = jnp.dtype(io_dtype) if io_dtype is not None else x.dtype
    esize = jnp.dtype(out_dtype).itemsize

    x = x.astype(out_dtype)
    w = w.astype(out_dtype)           # MXU operands in I/O dtype; acc stays f32
    b32 = b.astype(jnp.float32)

    # Fold sqrt(C_out) into the gain once; epilogue params in the epilogue dtype.
    param_dtype = jnp.bfloat16 if out_dtype == jnp.bfloat16 else jnp.float32
    g_f32 = g.astype(jnp.float32) * math.sqrt(C_out)
    g_scaled = g_f32.astype(param_dtype)

    vmem_cap = _vmem_capacity_bytes()
    tn = tile_n if tile_n is not None else _choose_tile_n(
        N, B, C_in, C_out, esize, vmem_cap)

    # Ragged last node-tile is handled by Pallas (masked writeback); no wrapper
    # pad/slice HBM round trips.
    grid = (B, pl.cdiv(N, tn))

    x_spec = pl.BlockSpec((None, C_in, tn), lambda bi, ni: (bi, 0, ni))
    w_spec = pl.BlockSpec((C_out, C_in), lambda bi, ni: (0, 0))
    b_spec = pl.BlockSpec((C_out, 1), lambda bi, ni: (0, 0))
    g_spec = pl.BlockSpec((C_out, 1), lambda bi, ni: (0, 0))
    o_spec = pl.BlockSpec((None, C_out, tn), lambda bi, ni: (bi, 0, ni))
    out_shape = jax.ShapeDtypeStruct((B, C_out, N), out_dtype)

    if vmem_limit_bytes is None:
        est = (2 * (C_in + C_out) * tn * esize        # double-buffered x/out tiles
               + 4 * 4 * C_out * tn                   # f32 intermediates (y, y*y, SiLU)
               + 2 * 4 * (C_out * C_in + 4 * C_out)   # resident params (2-buffered)
               + (2 << 20))                           # slack
        upper = min(int(vmem_cap * 0.85), vmem_cap - (8 << 20))
        vmem_limit_bytes = int(min(max(est, min(32 << 20, upper)), upper))

    cp = pltpu.CompilerParams(
        dimension_semantics=("parallel", "parallel"),
        vmem_limit_bytes=vmem_limit_bytes,
    )

    if scale_shift is None:
        out = pl.pallas_call(
            _block_kernel,
            out_shape=out_shape,
            grid=grid,
            in_specs=[x_spec, w_spec, b_spec, g_spec],
            out_specs=o_spec,
            compiler_params=cp,
        )(x, w, b32, g_scaled)
    else:
        scale, shift = scale_shift
        # Fold m = g*sqrt(C_out)*(scale+1) per (B, C_out, 1) in the wrapper.
        m = (g_f32[None] * (scale.astype(jnp.float32) + 1.0)).astype(param_dtype)
        sh = shift.astype(param_dtype)
        ss_spec = pl.BlockSpec((None, C_out, 1), lambda bi, ni: (bi, 0, 0))
        out = pl.pallas_call(
            _block_kernel_ss,
            out_shape=out_shape,
            grid=grid,
            in_specs=[x_spec, w_spec, b_spec, ss_spec, ss_spec],
            out_specs=o_spec,
            compiler_params=cp,
        )(x, w, b32, m, sh)

    return out


# ---------------------------------------------------------------------------
# Pure-JAX references
# ---------------------------------------------------------------------------
def _reference(x, w, b, g):
    y = jnp.einsum("oi,bin->bon", w, x) + b[None]            # Conv1d(k=1)
    norm = jnp.sqrt(jnp.sum(y * y, axis=1, keepdims=True))   # F.normalize dim=1
    y = y / jnp.maximum(norm, 1e-12)
    y = y * g[None] * math.sqrt(w.shape[0])
    return y * jax.nn.sigmoid(y)                             # SiLU


def _reference_ss(x, w, b, g, scale, shift):
    y = jnp.einsum("oi,bin->bon", w, x) + b[None]
    norm = jnp.sqrt(jnp.sum(y * y, axis=1, keepdims=True))
    y = y / jnp.maximum(norm, 1e-12)
    y = y * g[None] * math.sqrt(w.shape[0])
    y = y * (scale + 1.0) + shift
    return y * jax.nn.sigmoid(y)


# ---------------------------------------------------------------------------
# Self-test
# ---------------------------------------------------------------------------
if __name__ == "__main__":
    key = jax.random.PRNGKey(0)
    B, C_in, C_out, N = 2, 4, 8, 16

    k1, k2, k3, k4, k5 = jax.random.split(key, 5)
    bound = 1.0 / math.sqrt(C_in)
    w = jax.random.uniform(k1, (C_out, C_in), jnp.float32, -bound, bound)
    b = jax.random.uniform(k2, (C_out, 1), jnp.float32, -bound, bound)
    g = jnp.ones((C_out, 1), jnp.float32)
    x = jax.random.normal(k3, (B, C_in, N), jnp.float32)

    # 1) plain path (f32), single full-dim tile
    out = jax.block_until_ready(block_forward(x, w, b, g))
    ref = _reference(x, w, b, g)
    assert out.shape == (B, C_out, N)
    assert jnp.allclose(out, ref, atol=1e-4, rtol=1e-4)

    # 2) scale_shift path against its own reference (m folded in the wrapper)
    scale = 0.1 * jax.random.normal(k4, (B, C_out, 1), jnp.float32)
    shift = 0.1 * jax.random.normal(k5, (B, C_out, 1), jnp.float32)
    out_ss = jax.block_until_ready(block_forward(x, w, b, g, (scale, shift)))
    ref_ss = _reference_ss(x, w, b, g, scale, shift)
    assert jnp.allclose(out_ss, ref_ss, atol=1e-4, rtol=1e-4)

    # 3) ragged node axis: grid=(B, cdiv(N, 128)), last tile masked in-kernel
    #    (no wrapper pad/slice, output comes back at the exact size)
    N2 = 200
    x2 = jax.random.normal(k3, (B, C_in, N2), jnp.float32)
    out2 = jax.block_until_ready(block_forward(x2, w, b, g, tile_n=128))
    ref2 = _reference(x2, w, b, g)
    assert out2.shape == (B, C_out, N2)
    assert jnp.allclose(out2, ref2, atol=1e-4, rtol=1e-4)

    # 4) bf16 I/O smoke test (halves HBM traffic; bf16 epilogue on the VPU);
    #    matmul accumulation + norm math stay f32 in-kernel
    outb = jax.block_until_ready(
        block_forward(x2, w, b, g, tile_n=128, io_dtype=jnp.bfloat16))
    refb = _reference(x2.astype(jnp.bfloat16).astype(jnp.float32),
                      w.astype(jnp.bfloat16).astype(jnp.float32), b, g)
    assert outb.dtype == jnp.bfloat16
    assert jnp.allclose(outb.astype(jnp.float32), refb, atol=5e-2, rtol=5e-2)

    print("KERNEL_OK")
</pallas_src>

<mosaic_0001>
module attributes {stable_mosaic.version = 11 : i64} {
  func.func @_block_kernel(%arg0: i32, %arg1: i32, %arg2: memref<1x4x16xf32, #tpu.memory_space<vmem>>, %arg3: memref<8x4xf32, #tpu.memory_space<vmem>>, %arg4: memref<8x1xf32, #tpu.memory_space<vmem>>, %arg5: memref<8x1xf32, #tpu.memory_space<vmem>>, %arg6: memref<1x8x16xf32, #tpu.memory_space<vmem>>) attributes {dimension_semantics = [#tpu.dimension_semantics<parallel>, #tpu.dimension_semantics<parallel>], iteration_bounds = array<i64: 2, 1>, scalar_prefetch = 0 : i64, scratch_operands = 0 : i64, tpu.core_type = #tpu.core_type<tc>, window_params = [{transform_indices = @transform_0, window_bounds = array<i64: 1, 4, 16>}, {pipeline_mode = #tpu.pipeline_mode<synchronous>, transform_indices = @transform_1, window_bounds = array<i64: 8, 4>}, {pipeline_mode = #tpu.pipeline_mode<synchronous>, transform_indices = @transform_2, window_bounds = array<i64: 8, 1>}, {pipeline_mode = #tpu.pipeline_mode<synchronous>, transform_indices = @transform_3, window_bounds = array<i64: 8, 1>}, {transform_indices = @transform_4, window_bounds = array<i64: 1, 8, 16>}]} {
    %c0 = arith.constant 0 : index
    %c0_0 = arith.constant 0 : index
    %c0_1 = arith.constant 0 : index
    %0 = vector.load %arg2[%c0, %c0_0, %c0_1] : memref<1x4x16xf32, #tpu.memory_space<vmem>>, vector<1x4x16xf32>
    %1 = vector.shape_cast %0 : vector<1x4x16xf32> to vector<4x16xf32>
    %c0_2 = arith.constant 0 : index
    %c0_3 = arith.constant 0 : index
    %2 = vector.load %arg3[%c0_2, %c0_3] : memref<8x4xf32, #tpu.memory_space<vmem>>, vector<8x4xf32>
    %cst = arith.constant dense<0.000000e+00> : vector<8x16xf32>
    %3 = tpu.matmul %2, %1, %cst {dimension_numbers = #tpu.dot_dimension_numbers<[1], [0], [0], [1], [0, 0, 1, 1], [], []>} : vector<8x4xf32>, vector<4x16xf32>, vector<8x16xf32> -> vector<8x16xf32>
    %c0_4 = arith.constant 0 : index
    %c0_5 = arith.constant 0 : index
    %4 = vector.load %arg4[%c0_4, %c0_5] : memref<8x1xf32, #tpu.memory_space<vmem>>, vector<8x1xf32>
    %5 = vector.broadcast %4 : vector<8x1xf32> to vector<8x16xf32>
    %6 = arith.addf %3, %5 : vector<8x16xf32>
    %7 = arith.mulf %6, %6 : vector<8x16xf32>
    %cst_6 = arith.constant dense<0.000000e+00> : vector<16xf32>
    %8 = vector.multi_reduction <add>, %7, %cst_6 [0] : vector<8x16xf32> to vector<16xf32>
    %9 = vector.shape_cast %8 : vector<16xf32> to vector<1x16xf32>
    %cst_7 = arith.constant 1.000000e-24 : f32
    %10 = vector.broadcast %cst_7 : f32 to vector<1x16xf32>
    %11 = arith.maximumf %9, %10 : vector<1x16xf32>
    %12 = math.rsqrt %11 : vector<1x16xf32>
    %13 = vector.broadcast %12 : vector<1x16xf32> to vector<8x16xf32>
    %14 = arith.mulf %6, %13 : vector<8x16xf32>
    %c0_8 = arith.constant 0 : index
    %c0_9 = arith.constant 0 : index
    %15 = vector.load %arg5[%c0_8, %c0_9] : memref<8x1xf32, #tpu.memory_space<vmem>>, vector<8x1xf32>
    %16 = vector.broadcast %15 : vector<8x1xf32> to vector<8x16xf32>
    %17 = arith.mulf %14, %16 : vector<8x16xf32>
    %18 = arith.negf %17 : vector<8x16xf32>
    %19 = math.exp %18 : vector<8x16xf32>
    %cst_10 = arith.constant 1.000000e+00 : f32
    %20 = vector.broadcast %cst_10 : f32 to vector<8x16xf32>
    %21 = arith.addf %20, %19 : vector<8x16xf32>
    %22 = arith.divf %20, %21 : vector<8x16xf32>
    %23 = arith.mulf %17, %22 : vector<8x16xf32>
    %c0_11 = arith.constant 0 : index
    %c0_12 = arith.constant 0 : index
    %c0_13 = arith.constant 0 : index
    %24 = vector.load %arg6[%c0_11, %c0_12, %c0_13] : memref<1x8x16xf32, #tpu.memory_space<vmem>>, vector<1x8x16xf32>
    %25 = vector.shape_cast %24 : vector<1x8x16xf32> to vector<8x16xf32>
    %26 = vector.shape_cast %23 : vector<8x16xf32> to vector<1x8x16xf32>
    tpu.vector_store %arg6[%c0_11, %c0_12, %c0_13], %26 {strides = array<i32>} : memref<1x8x16xf32, #tpu.memory_space<vmem>>, vector<1x8x16xf32>,
    return
  }
  func.func @transform_0(%arg0: i32, %arg1: i32) -> (i32, i32, i32) {
    %c0_i32 = arith.constant 0 : i32
    %c0_i32_0 = arith.constant 0 : i32
    return %arg0, %c0_i32, %arg1 : i32, i32, i32
  }
  func.func @transform_1(%arg0: i32, %arg1: i32) -> (i32, i32) {
    %c0_i32 = arith.constant 0 : i32
    %c0_i32_0 = arith.constant 0 : i32
    %c0_i32_1 = arith.constant 0 : i32
    return %c0_i32, %c0_i32_0 : i32, i32
  }
  func.func @transform_2(%arg0: i32, %arg1: i32) -> (i32, i32) {
    %c0_i32 = arith.constant 0 : i32
    %c0_i32_0 = arith.constant 0 : i32
    %c0_i32_1 = arith.constant 0 : i32
    return %c0_i32, %c0_i32_0 : i32, i32
  }
  func.func @transform_3(%arg0: i32, %arg1: i32) -> (i32, i32) {
    %c0_i32 = arith.constant 0 : i32
    %c0_i32_0 = arith.constant 0 : i32
    %c0_i32_1 = arith.constant 0 : i32
    return %c0_i32, %c0_i32_0 : i32, i32
  }
  func.func @transform_4(%arg0: i32, %arg1: i32) -> (i32, i32, i32) {
    %c0_i32 = arith.constant 0 : i32
    %c0_i32_0 = arith.constant 0 : i32
    return %arg0, %c0_i32, %arg1 : i32, i32, i32
  }
}

</mosaic_0001>

<bundles_post_ra>
// kernel: tpu_custom_call.1
= control target key start
LH: loop header
LB: loop body
LE: loop exit
PB: predicated region body
PF: predicated region fallthrough
CT: control target
= control target key end

     0   :  { %9 = vsyncpa [#allocation3], 0  ;;  %s682_s0 = inlined_call_operand.vmem [shape: f32[2,4,16], index: 0, kind: input, shape index: {}]   ;;  %s683_s1 = inlined_call_operand.vmem [shape: f32[8,4], index: 1, kind: input, shape index: {}]   ;;  %s684_s2 = inlined_call_operand.vmem [shape: f32[8,1], index: 2, kind: input, shape index: {}]   ;;  %s685_s3 = inlined_call_operand.vmem [shape: f32[8,1], index: 3, kind: input, shape index: {}]   ;;  %s686_s4 = inlined_call_operand.hbm [shape: f32[2,8,16], index: 4, kind: output, shape index: {}]  }
   0x1   :  { %11 = vsyncpa [#allocation3 + $0x1], 0  ;;  %s574_s15 = smov 0   ;;  %s576_s16 = smov 0  }
   0x2   :  { %s578_s17 = smov 0   ;;  %s580_s18 = smov 0  }
   0x3   :  { %s582_s19 = smov 0   ;;  %s584_s20 = smov 0  }
   0x4 LB: > { %s391_s21 = sadd.s32 4294967295, %s546_s20   ;;  %s392_s22 = sadd.s32 4294967294, %s546_s20   ;;  %s546_s20 = sphi %s584_s20, %s17_s20   ;;  %s542_s19 = sphi %s582_s19, %s693_s19   ;;  %s538_s18 = sphi %s580_s18, %s692_s18   ;;  %s534_s17 = sphi %s578_s17, %s691_s17   ;;  %s530_s16 = sphi %s576_s16, %s690_s16   ;;  %s526_s15 = sphi %s574_s15, %s689_s15  }
   0x5   : > { %s29_s23 = sadd.s32 1, %s542_s19  ;;  %s129_s24 = sadd.s32 1, %s534_s17 }
   0x6   : > { %p31_p0 = scmp.ge.s32.totalorder %s29_s23, 2  ;;  %p139_p1 = scmp.ne.s32.totalorder %s534_s17, %s530_s16 }
   0x7   : > { %p140_p2 = scmp.eq.s32.totalorder %s391_s21, 1  ;;  %p145_p3 = scmp.ne.s32.totalorder %s530_s16, %s526_s15 }
   0x8   : > { %s695_s23 = smov (%p31_p0, %s29_s23), 0  ;;  %p146_p5 = scmp.eq.s32.totalorder %s392_s22, 1 }
   0x9   : > { %p614_p4 = por %p140_p2, %p139_p1  ;;  %s124_s26 = ssub.s32 %s542_s19, %s695_s23 }
   0xa   : > { %p395_p6 = scmp.ge.s32.totalorder %s546_s20, 1  ;;  %p127_p7 = scmp.eq.s32.totalorder %s124_s26, 0 }
   0xb   : > { %p621_p8 = por %p146_p5, %p145_p3  ;;  %p183_p9 = scmp.lt.s32.totalorder %s546_s20, 3 }
   0xc   : > { %s627_s28 = scalar_select %p127_p7, %s534_s17, %s129_s24  }
   0xd   : > { %p184_p10 = pnand %p395_p6, %p183_p9 }
   0xe   : > { %p211_p11 = scmp.lt.s32.totalorder (!%p184_p10), %s538_s18, 1  ;;  %s208_s14 = sand.u32 (!%p184_p10), 1, %s530_s16  }
   0xf   : > { %187 = sbr.rel (%p184_p10) target bundleno = 226 (0xe2), region = 36  ;;  %s396_s21 = sshll.u32 (!%p184_p10), %s208_s14, 3 }
  0x10   : > { %s402_s22 = sshll.u32 (!%p184_p10), %s538_s18, 3  ;;  %s210_s30 = scalar_lea.vmem (!%p184_p10), [#allocation2], %s396_s21 }
  0x11   : > { %s315_s29 = scalar_lea.hbm (!%p184_p10), %s686_s4, %s402_s22  ;;  %s488_s11 = scalar_lea.hbm (!%p184_p10), %s686_s4, 16 }
  0x14   : > { %v220_v0 = vld [vmem:[%s684_s2] sm:$0xff]  ;;  %v548_v1 = vmov 0   ;;  %s212_s5 = scalar_select %p211_p11, %s538_s18, 1  ;;  %vm230_vm0 = vcmask 1043456   ;;  %vm226_vm1 = vcmask 31744   ;;  %vm255_vm2 = vcmask 130048  }
  0x15   : > { %461 = vset.pattern.permute.xlu0 %v548_v1  ;;  %v219_v2 = vld [vmem:[%s683_s1] sm:$0xff]  ;;  %s304_s18 = scalar_lea.sflag [#allocation3], %s208_s14 }
  0x16   : > { %223 = vperm.xlu0 %461, %v220_v0   ;;  %s397_s6 = sshll.u32 %s212_s5, 2  ;;  %v275_v4 = vld [vmem:[%s685_s3] sm:$0xff]  ;;  %s317_s5 = sshll.u32 %s210_s30, 4  ;;  %s318_s5 = int_to_ptr.vmem [resolvable:$true] %s317_s5 }
  0x17   : > { %s217_s9 = scalar_lea.vmem %s682_s0, %s397_s6  ;;  %s319_s6 = sshll.u32 %s315_s29, 4  ;;  %s320_s6 = int_to_ptr.hbm [resolvable:$true] %s319_s6 }
  0x18   : > { %v218_v3 = vld [vmem:[%s217_s9] sm:$0xf]  ;;  %s482_s7 = sshra.s32 %s320_s6, 4  ;;  %s483_s7 = int_to_ptr.hbm [resolvable:$true] %s482_s7 }
  0x19   : > { %398 = vmatpush.msk.msra.mxu0 %vm230_vm0, %v218_v3  ;;  %s484_s8 = scalar_lea.hbm %s483_s7, 8  ;;  %p489_p1 = scmp.lt.s32.totalorder %s483_s7, %s686_s4 }
  0x1a   : > { %399 = vmatmul.msk.f32.vlgmr.msra.gmra.mxu0 %vm226_vm1, %v219_v2  ;;  %p485_p12 = scmp.ne.s32.totalorder %s483_s7, %s484_s8  ;;  %p490_p2 = scmp.lt.s32.totalorder %s488_s11, %s484_s8 }
  0x1c   : > { %p486_p13 = pnand %p485_p12, %p614_p4  ;;  %p491_p3 = por %p490_p2, %p489_p1 }
  0x1e   : > { %278 = vperm.xlu0 %461, %v275_v4   ;;  %p487_p0 = pneg %p486_p13 }
  0x20   : > { %p492_p5 = pnand %p491_p3, %p487_p0 }
  0x88   : > { %v224_v5 = vpop.permute.xlu0 %223 }
  0x90   : > { %v279_v25 = vpop.permute.xlu0 %278 }
  0x97   : > { %v251_v6 = vpop.f32.mrf.mxu0 }
  0x98   : > { %v252_v7 = vadd.f32 %v251_v6, %v224_v5 }
  0x9a   : > { %v254_v8 = vmul.f32 %v252_v7, %v252_v7 }
  0x9c   : > { %v256_v9 = vsel %vm255_vm2, %v254_v8, 0.0 }
  0x9d   : > { %v257_v10 = vrot.slane %v256_v9, 4 }
  0x9f   : > { %v258_v11 = vadd.f32 %v257_v10, %v256_v9 }
  0xa1   : > { %v259_v12 = vrot.slane %v258_v11, 2 }
  0xa3   : > { %v260_v13 = vadd.f32 %v259_v12, %v258_v11 }
  0xa5   : > { %v261_v14 = vrot.slane %v260_v13, 1 }
  0xa7   : > { %v262_v15 = vadd.f32 %v261_v14, %v260_v13 }
  0xa9   : > { %v263_v16 = vmax.f32 %v262_v15, 1e-24 }
  0xab   : > { %462 = vrsqrt.f32 %v263_v16  ;;  %vm270_vm4 = vweird.f32 %v263_v16 }
  0xb1   : > { %v463_v17 = vpop.eup %462 }
  0xb2   : > { %v265_v18 = vmul.f32 %v463_v17, %v263_v16  ;;  %vm271_vm3 = vweird.f32 %v463_v17 }
  0xb3   : > { %vm272_vm5 = vmor %vm270_vm4, %vm271_vm3 }
  0xb4   : > { %v266_v19 = vmul.f32 %v463_v17, %v265_v18 }
  0xb6   : > { %v267_v20 = vmul.f32 0.5, %v266_v19 }
  0xb8   : > { %v268_v21 = vsub.f32 1.5, %v267_v20 }
  0xba   : > { %v269_v22 = vmul.f32 %v463_v17, %v268_v21 }
  0xbc   : > { %v273_v23 = vsel %vm272_vm5, %v463_v17, %v269_v22 }
  0xbd   : > { %v274_v24 = vmul.f32 %v273_v23, %v252_v7 }
  0xbf   : > { %v281_v26 = vmul.f32 %v279_v25, %v274_v24 }
  0xc1   : > { %v400_v27 = vmul.f32 -1.442695, %v281_v26 }
  0xc3   : > { %464 = vpow2.f32 %v400_v27 }
  0xc9   : > { %v465_v28 = vpop.eup %464 }
  0xca   : > { %v285_v29 = vadd.f32 1.0, %v465_v28 }
  0xcc   : > { %466 = vrcp.f32 %v285_v29  ;;  %v297_v33 = vand.u32 2147483648, %v285_v29  ;;  %v295_v35 = vand.u32 2147483647, %v285_v29  ;;  %vm291_vm7 = vweird.f32 %v285_v29 }
  0xce   : > { %v298_v37 = vor.u32 1.1754944e-38, %v297_v33  ;;  %vm296_vm9 = vcmp.eq.f32.partialorder %v295_v35, 8.507059e+37 }
  0xd2   : > { %v467_v30 = vpop.eup %466 }
  0xd3   : > { %v287_v31 = vmul.f32 %v467_v30, %v285_v29  ;;  %vm292_vm6 = vweird.f32 %v467_v30 }
  0xd4   : > { %vm293_vm8 = vmor %vm291_vm7, %vm292_vm6 }
  0xd5   : > { %v288_v32 = vsub.f32 1.0, %v287_v31 }
  0xd7   : > { %v289_v34 = vmul.f32 %v467_v30, %v288_v32 }
  0xd9   : > { %v290_v36 = vadd.f32 %v467_v30, %v289_v34 }
  0xdb   : > { %v294_v38 = vsel %vm293_vm8, %v467_v30, %v290_v36 }
  0xdc   : > { %v299_v39 = vsel %vm296_vm9, %v298_v37, %v294_v38 }
  0xdd   : > { %v301_v40 = vmul.f32 %v299_v39, %v281_v26 }
  0xdf   : > { %302 = vst.msk [vmem:[%s210_s30] sm:$0xff] %vm255_vm2, %v301_v40 }
  0xe0   : > { %495 = shalt.err (!%p492_p5)
}
  0xe1   : > { %405 = dma.vmem_to_hbm [thread:$0]  (%p614_p4), %s318_s5, 128, %s320_s6, %s304_s18  }
  0xe2 PF: > { %p411_p6 = scmp.ge.s32.totalorder %s546_s20, 2  ;;  %s331_s14 = sand.u32 1, %s526_s15  }
  0xe3   : > { %s332_s21 = scalar_lea.sflag [#allocation3], %s331_s14 }
  0xe4   : > { %p408_p7 = pnand %p411_p6, %p621_p8 }
  0xe6   : > { %p409_p9 = pneg %p408_p7 }
  0xe8   : > { %521 = dma.done.wait (%p409_p9), %s332_s21, 128  }
  0xe9   : > { %523 = vsyncadd (%p409_p9), %s332_s21, 4294967168  ;;  %s17_s20 = sadd.s32 1, %s546_s20   ;;  %s689_s15 = smov %s530_s16 }
  0xea   : > { %p14_p10 = scmp.ge.s32.totalorder %s17_s20, 4   ;;  %s690_s16 = smov %s534_s17 }
  0xeb   : > { %s691_s17 = smov %s627_s28  ;;  %s692_s18 = smov %s542_s19 }
  0xec   : > { %s693_s19 = smov %s695_s23  ;;  %16 = sbr.rel (!%p14_p10) target bundleno = 4 (0x4), region = 71 }
  0xf1   :  { %338 = vsyncpa [#allocation3], 1 }
  0xf2   :  { %340 = vsyncpa [#allocation3 + $0x1], 1 }

</bundles_post_ra>
